<compile_context>
chip_gen: v6e
topology: v6e:2x2x1
jax: 0.10.0
libtpu: 0.0.40
codegen_flags: <defaults>
</compile_context>

<pallas_src>
import math
import functools

import jax
import jax.numpy as jnp
from jax.experimental import pallas as pl
from jax.experimental.pallas import tpu as pltpu


# ----------------------------- Pallas kernel ------------------------------- #

def _conv_tap_kernel(taps, l_wide, x_ref, w_ref, b_ref, o_ref):
    """One (batch, Cout-tile) grid step:  o = sum_t W[t] @ x[:, off_t:off_t+L] + b.

    x_ref : (1, C, S)        channels x flattened (padded) spatial
    w_ref : (T, TCo, C)      per-tap weight matrices
    b_ref : (TCo, 1)         bias column
    o_ref : (1, TCo, L)      lane-dense, Cout-major output tile
    """
    acc = jnp.dot(w_ref[0], x_ref[0, :, pl.ds(taps[0], l_wide)],
                  preferred_element_type=jnp.float32)
    for t in range(1, len(taps)):
        acc = acc + jnp.dot(w_ref[t], x_ref[0, :, pl.ds(taps[t], l_wide)],
                            preferred_element_type=jnp.float32)
    # Bias add stays in f32 even if the streamed operands were cast to bf16.
    o_ref[0] = (acc + b_ref[...]).astype(o_ref.dtype)


def _conv_taps_pallas(x_flat, w_taps, bias_col, taps, l_wide):
    """out[n, co, l] = sum_t (w_taps[t] @ x_flat[n, :, taps[t]:taps[t]+l_wide]) + b."""
    N, C, S = x_flat.shape
    T, Cout, _ = w_taps.shape

    # Tile Cout only when it is large (keeps the weight/out blocks bounded on
    # v7x's smaller VMEM); for small Cout one tile == full Cout.
    cout_tile = Cout if Cout <= 256 else 256
    n_co = pl.cdiv(Cout, cout_tile)

    kernel = functools.partial(_conv_tap_kernel, tuple(int(t) for t in taps),
                               int(l_wide))

    isz = x_flat.dtype.itemsize
    step_bytes = (C * S * isz                    # resident image block
                  + T * cout_tile * C * isz      # resident weight taps
                  + cout_tile * 4                # bias column
                  + cout_tile * l_wide * 4       # output tile
                  + 2 * C * l_wide * isz)        # transient tap slices
    # Double-buffering + headroom; cap at 48 MiB so it also fits v7x (64 MiB).
    vmem_limit = int(min(max(4 * step_bytes, 32 * 1024 * 1024),
                         48 * 1024 * 1024))

    flops = 2 * N * T * Cout * C * l_wide
    bytes_accessed = (n_co * N * C * S * isz            # image reads
                      + N * T * Cout * C * isz          # weight reads
                      + N * Cout * l_wide * 4           # output writes
                      + Cout * 4)                       # bias

    return pl.pallas_call(
        kernel,
        out_shape=jax.ShapeDtypeStruct((N, Cout, l_wide), jnp.float32),
        grid_spec=pltpu.PrefetchScalarGridSpec(
            num_scalar_prefetch=0,
            grid=(N, n_co),
            in_specs=[
                pl.BlockSpec((1, C, S), lambda n, co: (n, 0, 0)),
                pl.BlockSpec((T, cout_tile, C), lambda n, co: (0, co, 0)),
                pl.BlockSpec((cout_tile, 1), lambda n, co: (co, 0)),
            ],
            out_specs=pl.BlockSpec((1, cout_tile, l_wide),
                                   lambda n, co: (n, co, 0)),
        ),
        compiler_params=pltpu.CompilerParams(
            dimension_semantics=("parallel", "parallel"),
            vmem_limit_bytes=vmem_limit),
        cost_estimate=pl.CostEstimate(flops=int(flops), transcendentals=0,
                                      bytes_accessed=int(bytes_accessed)),
    )(x_flat, w_taps, bias_col)


# ------------------------------- JAX glue ---------------------------------- #

def _to_tuple(x):
    return x if isinstance(x, tuple) else (x, x)


def _im2col(x, kh, kw, stride, pad):
    """torch.nn.functional.unfold ordering (channel-major, then kh, kw).

    x: (N, C, H, W) -> (N, C*kh*kw, Hout*Wout).  Only used for stride != 1.
    """
    if pad[0] or pad[1]:
        x = jnp.pad(x, ((0, 0), (0, 0), (pad[0], pad[0]), (pad[1], pad[1])))
    N, C, H, W = x.shape
    h_out = (H - kh) // stride[0] + 1
    w_out = (W - kw) // stride[1] + 1
    cols = []
    for i in range(kh):
        for j in range(kw):
            cols.append(x[:, :,
                          i:i + stride[0] * h_out:stride[0],
                          j:j + stride[1] * w_out:stride[1]])
    col = jnp.stack(cols, axis=2).reshape(N, C * kh * kw, h_out * w_out)
    return col


class CustomConvPallas:
    """JAX/Pallas re-implementation of the PyTorch CustomConv module."""

    def __init__(self, in_channels, out_channels, kernel_size=3, stride=1,
                 padding=0, bias=True, *, key=None, compute_dtype=jnp.float32):
        self.k = _to_tuple(kernel_size)
        self.in_c = in_channels
        self.out_c = out_channels
        self.stride = _to_tuple(stride)
        self.compute_dtype = compute_dtype   # set jnp.bfloat16 on v6e/v7x for BW
        if padding == 'same':
            if stride != 1 and stride != (1, 1):
                raise Exception("Padding 'same' can only be used with stride = 1")
            self.padding = padding
        else:
            self.padding = _to_tuple(padding)

        if key is None:
            key = jax.random.PRNGKey(0)
        k_w, k_b = jax.random.split(key)

        # kaiming_normal_(mode='fan_out', nonlinearity='relu'):
        # std = sqrt(2 / fan_out), fan_out = out_c * kh * kw.
        fan_out = out_channels * self.k[0] * self.k[1]
        std = math.sqrt(2.0 / fan_out)
        self.weight = std * jax.random.normal(
            k_w, (out_channels, in_channels, self.k[0], self.k[1]), jnp.float32)

        if bias:
            fan_in = in_channels * self.k[0] * self.k[1]
            bound = 1.0 / math.sqrt(fan_in) if fan_in != 0 else 0.0
            self.bias = jax.random.uniform(
                k_b, (out_channels,), jnp.float32, minval=-bound, maxval=bound)
        else:
            # Original module would fail on forward with bias=None; zero bias
            # is the numerically-equivalent well-defined choice.
            self.bias = jnp.zeros((out_channels,), jnp.float32)

    def __call__(self, x):
        return self.forward(x)

    @functools.partial(jax.jit, static_argnums=0)
    def forward(self, x):
        kh, kw = self.k
        sh, sw = self.stride
        N, Cin, h_in, w_in = x.shape
        Cout = self.out_c

        padding = self.padding
        if padding == 'same':
            # Matches the module's own formula (symmetric (k-1)//2 via F.unfold),
            # which differs from torch.nn.Conv2d padding='same' for even kernels.
            padding = ((kh - 1) // 2, (kw - 1) // 2)
        ph, pw = padding
        h_out = (h_in + 2 * ph - (kh - 1) - 1) // sh + 1
        w_out = (w_in + 2 * pw - (kw - 1) - 1) // sw + 1

        x = x.astype(jnp.float32)

        if (sh, sw) == (1, 1):
            # ---- Fused path: im2col never materialized. --------------------
            Hp, Wp = h_in + 2 * ph, w_in + 2 * pw
            extra = 1 if kw > 1 else 0   # one zero tail row keeps tap slices in-bounds
            if ph or pw or extra:
                xp = jnp.pad(x, ((0, 0), (0, 0), (ph, ph + extra), (pw, pw)))
            else:
                xp = x
            S = (Hp + extra) * Wp
            x_flat = xp.reshape(N, Cin, S)            # free (contiguous) reshape
            l_wide = h_out * Wp                       # full-width rows; sliced below
            taps = tuple(i * Wp + j for i in range(kh) for j in range(kw))
            w_taps = jnp.transpose(self.weight, (2, 3, 0, 1)).reshape(
                kh * kw, Cout, Cin)
        else:
            # ---- General-stride fallback: unfold feeds the same kernel. ----
            # TODO(synk): in-kernel strided gather would avoid the kh*kw HBM
            # inflation for stride > 1 as well.
            x_flat = _im2col(x, kh, kw, (sh, sw), (ph, pw))   # (N, Cin*kh*kw, L)
            l_wide = h_out * w_out
            taps = (0,)
            w_taps = self.weight.reshape(1, Cout, Cin * kh * kw)

        if self.compute_dtype != jnp.float32:
            x_flat = x_flat.astype(self.compute_dtype)
            w_taps = w_taps.astype(self.compute_dtype)

        bias_col = self.bias.reshape(Cout, 1).astype(jnp.float32)

        out = _conv_taps_pallas(x_flat, w_taps, bias_col, taps, l_wide)

        if (sh, sw) == (1, 1):
            Wp = w_in + 2 * pw
            out = out.reshape(N, Cout, h_out, Wp)[:, :, :, :w_out]
        else:
            out = out.reshape(N, Cout, h_out, w_out)
        return out


# -------------------------------- main -------------------------------------- #

if __name__ == "__main__":
    key = jax.random.PRNGKey(0)
    k_x, k_p = jax.random.split(key)

    N, Cin, H, W = 2, 4, 16, 16
    Cout, ksize, stride, pad = 8, 3, 1, 0

    x = jax.random.normal(k_x, (N, Cin, H, W), jnp.float32)

    # --- main case: stride 1, no padding (fused path) ---
    conv = CustomConvPallas(Cin, Cout, kernel_size=ksize, stride=stride,
                            padding=pad, bias=True, key=k_p)
    out = jax.block_until_ready(conv(x))

    h_out = (H - (ksize - 1) - 1) // stride + 1
    w_out = (W - (ksize - 1) - 1) // stride + 1
    assert out.shape == (N, Cout, h_out, w_out), out.shape

    ref = jax.lax.conv_general_dilated(
        x, conv.weight, window_strides=(stride, stride), padding='VALID',
        dimension_numbers=('NCHW', 'OIHW', 'NCHW')) + conv.bias.reshape(1, -1, 1, 1)
    assert jnp.allclose(out, ref, atol=1e-4, rtol=1e-4), \
        float(jnp.max(jnp.abs(out - ref)))

    # --- padding='same' (fused path with spatial padding) ---
    conv_same = CustomConvPallas(Cin, Cout, kernel_size=3, stride=1,
                                 padding='same', bias=True, key=k_p)
    out_same = jax.block_until_ready(conv_same(x))
    ref_same = jax.lax.conv_general_dilated(
        x, conv_same.weight, window_strides=(1, 1), padding='SAME',
        dimension_numbers=('NCHW', 'OIHW', 'NCHW')) + conv_same.bias.reshape(1, -1, 1, 1)
    assert out_same.shape == (N, Cout, H, W), out_same.shape
    assert jnp.allclose(out_same, ref_same, atol=1e-4, rtol=1e-4), \
        float(jnp.max(jnp.abs(out_same - ref_same)))

    # --- stride=2 (general fallback path, same kernel) ---
    conv_s2 = CustomConvPallas(Cin, Cout, kernel_size=3, stride=2,
                               padding=0, bias=True, key=k_p)
    out_s2 = jax.block_until_ready(conv_s2(x))
    ref_s2 = jax.lax.conv_general_dilated(
        x, conv_s2.weight, window_strides=(2, 2), padding='VALID',
        dimension_numbers=('NCHW', 'OIHW', 'NCHW')) + conv_s2.bias.reshape(1, -1, 1, 1)
    assert out_s2.shape == ref_s2.shape, (out_s2.shape, ref_s2.shape)
    assert jnp.allclose(out_s2, ref_s2, atol=1e-4, rtol=1e-4), \
        float(jnp.max(jnp.abs(out_s2 - ref_s2)))

    print("KERNEL_OK")
</pallas_src>

<mosaic_0001>
module attributes {stable_mosaic.version = 11 : i64} {
  func.func @_conv_tap_kernel(%arg0: i32, %arg1: i32, %arg2: memref<1x4x272xf32, #tpu.memory_space<vmem>>, %arg3: memref<9x8x4xf32, #tpu.memory_space<vmem>>, %arg4: memref<8x1xf32, #tpu.memory_space<vmem>>, %arg5: memref<1x8x224xf32, #tpu.memory_space<vmem>>) attributes {dimension_semantics = [#tpu.dimension_semantics<parallel>, #tpu.dimension_semantics<parallel>], iteration_bounds = array<i64: 2, 1>, scalar_prefetch = 0 : i64, scratch_operands = 0 : i64, tpu.core_type = #tpu.core_type<tc>, window_params = [{transform_indices = @transform_0, window_bounds = array<i64: 1, 4, 272>}, {transform_indices = @transform_1, window_bounds = array<i64: 9, 8, 4>}, {transform_indices = @transform_2, window_bounds = array<i64: 8, 1>}, {transform_indices = @transform_3, window_bounds = array<i64: 1, 8, 224>}]} {
    %c0 = arith.constant 0 : index
    %c0_0 = arith.constant 0 : index
    %c0_1 = arith.constant 0 : index
    %0 = vector.load %arg3[%c0, %c0_0, %c0_1] : memref<9x8x4xf32, #tpu.memory_space<vmem>>, vector<1x8x4xf32>
    %1 = vector.shape_cast %0 : vector<1x8x4xf32> to vector<8x4xf32>
    %c0_2 = arith.constant 0 : index
    %c0_3 = arith.constant 0 : index
    %c0_4 = arith.constant 0 : index
    %2 = vector.load %arg2[%c0_2, %c0_3, %c0_4] : memref<1x4x272xf32, #tpu.memory_space<vmem>>, vector<1x4x224xf32>
    %3 = vector.shape_cast %2 : vector<1x4x224xf32> to vector<4x224xf32>
    %cst = arith.constant dense<0.000000e+00> : vector<8x224xf32>
    %4 = tpu.matmul %1, %3, %cst {dimension_numbers = #tpu.dot_dimension_numbers<[1], [0], [0], [1], [0, 0, 1, 1], [], []>} : vector<8x4xf32>, vector<4x224xf32>, vector<8x224xf32> -> vector<8x224xf32>
    %c1 = arith.constant 1 : index
    %c0_5 = arith.constant 0 : index
    %c0_6 = arith.constant 0 : index
    %5 = vector.load %arg3[%c1, %c0_5, %c0_6] : memref<9x8x4xf32, #tpu.memory_space<vmem>>, vector<1x8x4xf32>
    %6 = vector.shape_cast %5 : vector<1x8x4xf32> to vector<8x4xf32>
    %c0_7 = arith.constant 0 : index
    %c0_8 = arith.constant 0 : index
    %c1_9 = arith.constant 1 : index
    %7 = vector.load %arg2[%c0_7, %c0_8, %c1_9] : memref<1x4x272xf32, #tpu.memory_space<vmem>>, vector<1x4x224xf32>
    %8 = vector.shape_cast %7 : vector<1x4x224xf32> to vector<4x224xf32>
    %cst_10 = arith.constant dense<0.000000e+00> : vector<8x224xf32>
    %9 = tpu.matmul %6, %8, %cst_10 {dimension_numbers = #tpu.dot_dimension_numbers<[1], [0], [0], [1], [0, 0, 1, 1], [], []>} : vector<8x4xf32>, vector<4x224xf32>, vector<8x224xf32> -> vector<8x224xf32>
    %10 = arith.addf %4, %9 : vector<8x224xf32>
    %c2 = arith.constant 2 : index
    %c0_11 = arith.constant 0 : index
    %c0_12 = arith.constant 0 : index
    %11 = vector.load %arg3[%c2, %c0_11, %c0_12] : memref<9x8x4xf32, #tpu.memory_space<vmem>>, vector<1x8x4xf32>
    %12 = vector.shape_cast %11 : vector<1x8x4xf32> to vector<8x4xf32>
    %c0_13 = arith.constant 0 : index
    %c0_14 = arith.constant 0 : index
    %c2_15 = arith.constant 2 : index
    %13 = vector.load %arg2[%c0_13, %c0_14, %c2_15] : memref<1x4x272xf32, #tpu.memory_space<vmem>>, vector<1x4x224xf32>
    %14 = vector.shape_cast %13 : vector<1x4x224xf32> to vector<4x224xf32>
    %cst_16 = arith.constant dense<0.000000e+00> : vector<8x224xf32>
    %15 = tpu.matmul %12, %14, %cst_16 {dimension_numbers = #tpu.dot_dimension_numbers<[1], [0], [0], [1], [0, 0, 1, 1], [], []>} : vector<8x4xf32>, vector<4x224xf32>, vector<8x224xf32> -> vector<8x224xf32>
    %16 = arith.addf %10, %15 : vector<8x224xf32>
    %c3 = arith.constant 3 : index
    %c0_17 = arith.constant 0 : index
    %c0_18 = arith.constant 0 : index
    %17 = vector.load %arg3[%c3, %c0_17, %c0_18] : memref<9x8x4xf32, #tpu.memory_space<vmem>>, vector<1x8x4xf32>
    %18 = vector.shape_cast %17 : vector<1x8x4xf32> to vector<8x4xf32>
    %c0_19 = arith.constant 0 : index
    %c0_20 = arith.constant 0 : index
    %c16 = arith.constant 16 : index
    %19 = vector.load %arg2[%c0_19, %c0_20, %c16] : memref<1x4x272xf32, #tpu.memory_space<vmem>>, vector<1x4x224xf32>
    %20 = vector.shape_cast %19 : vector<1x4x224xf32> to vector<4x224xf32>
    %cst_21 = arith.constant dense<0.000000e+00> : vector<8x224xf32>
    %21 = tpu.matmul %18, %20, %cst_21 {dimension_numbers = #tpu.dot_dimension_numbers<[1], [0], [0], [1], [0, 0, 1, 1], [], []>} : vector<8x4xf32>, vector<4x224xf32>, vector<8x224xf32> -> vector<8x224xf32>
    %22 = arith.addf %16, %21 : vector<8x224xf32>
    %c4 = arith.constant 4 : index
    %c0_22 = arith.constant 0 : index
    %c0_23 = arith.constant 0 : index
    %23 = vector.load %arg3[%c4, %c0_22, %c0_23] : memref<9x8x4xf32, #tpu.memory_space<vmem>>, vector<1x8x4xf32>
    %24 = vector.shape_cast %23 : vector<1x8x4xf32> to vector<8x4xf32>
    %c0_24 = arith.constant 0 : index
    %c0_25 = arith.constant 0 : index
    %c17 = arith.constant 17 : index
    %25 = vector.load %arg2[%c0_24, %c0_25, %c17] : memref<1x4x272xf32, #tpu.memory_space<vmem>>, vector<1x4x224xf32>
    %26 = vector.shape_cast %25 : vector<1x4x224xf32> to vector<4x224xf32>
    %cst_26 = arith.constant dense<0.000000e+00> : vector<8x224xf32>
    %27 = tpu.matmul %24, %26, %cst_26 {dimension_numbers = #tpu.dot_dimension_numbers<[1], [0], [0], [1], [0, 0, 1, 1], [], []>} : vector<8x4xf32>, vector<4x224xf32>, vector<8x224xf32> -> vector<8x224xf32>
    %28 = arith.addf %22, %27 : vector<8x224xf32>
    %c5 = arith.constant 5 : index
    %c0_27 = arith.constant 0 : index
    %c0_28 = arith.constant 0 : index
    %29 = vector.load %arg3[%c5, %c0_27, %c0_28] : memref<9x8x4xf32, #tpu.memory_space<vmem>>, vector<1x8x4xf32>
    %30 = vector.shape_cast %29 : vector<1x8x4xf32> to vector<8x4xf32>
    %c0_29 = arith.constant 0 : index
    %c0_30 = arith.constant 0 : index
    %c18 = arith.constant 18 : index
    %31 = vector.load %arg2[%c0_29, %c0_30, %c18] : memref<1x4x272xf32, #tpu.memory_space<vmem>>, vector<1x4x224xf32>
    %32 = vector.shape_cast %31 : vector<1x4x224xf32> to vector<4x224xf32>
    %cst_31 = arith.constant dense<0.000000e+00> : vector<8x224xf32>
    %33 = tpu.matmul %30, %32, %cst_31 {dimension_numbers = #tpu.dot_dimension_numbers<[1], [0], [0], [1], [0, 0, 1, 1], [], []>} : vector<8x4xf32>, vector<4x224xf32>, vector<8x224xf32> -> vector<8x224xf32>
    %34 = arith.addf %28, %33 : vector<8x224xf32>
    %c6 = arith.constant 6 : index
    %c0_32 = arith.constant 0 : index
    %c0_33 = arith.constant 0 : index
    %35 = vector.load %arg3[%c6, %c0_32, %c0_33] : memref<9x8x4xf32, #tpu.memory_space<vmem>>, vector<1x8x4xf32>
    %36 = vector.shape_cast %35 : vector<1x8x4xf32> to vector<8x4xf32>
    %c0_34 = arith.constant 0 : index
    %c0_35 = arith.constant 0 : index
    %c32 = arith.constant 32 : index
    %37 = vector.load %arg2[%c0_34, %c0_35, %c32] : memref<1x4x272xf32, #tpu.memory_space<vmem>>, vector<1x4x224xf32>
    %38 = vector.shape_cast %37 : vector<1x4x224xf32> to vector<4x224xf32>
    %cst_36 = arith.constant dense<0.000000e+00> : vector<8x224xf32>
    %39 = tpu.matmul %36, %38, %cst_36 {dimension_numbers = #tpu.dot_dimension_numbers<[1], [0], [0], [1], [0, 0, 1, 1], [], []>} : vector<8x4xf32>, vector<4x224xf32>, vector<8x224xf32> -> vector<8x224xf32>
    %40 = arith.addf %34, %39 : vector<8x224xf32>
    %c7 = arith.constant 7 : index
    %c0_37 = arith.constant 0 : index
    %c0_38 = arith.constant 0 : index
    %41 = vector.load %arg3[%c7, %c0_37, %c0_38] : memref<9x8x4xf32, #tpu.memory_space<vmem>>, vector<1x8x4xf32>
    %42 = vector.shape_cast %41 : vector<1x8x4xf32> to vector<8x4xf32>
    %c0_39 = arith.constant 0 : index
    %c0_40 = arith.constant 0 : index
    %c33 = arith.constant 33 : index
    %43 = vector.load %arg2[%c0_39, %c0_40, %c33] : memref<1x4x272xf32, #tpu.memory_space<vmem>>, vector<1x4x224xf32>
    %44 = vector.shape_cast %43 : vector<1x4x224xf32> to vector<4x224xf32>
    %cst_41 = arith.constant dense<0.000000e+00> : vector<8x224xf32>
    %45 = tpu.matmul %42, %44, %cst_41 {dimension_numbers = #tpu.dot_dimension_numbers<[1], [0], [0], [1], [0, 0, 1, 1], [], []>} : vector<8x4xf32>, vector<4x224xf32>, vector<8x224xf32> -> vector<8x224xf32>
    %46 = arith.addf %40, %45 : vector<8x224xf32>
    %c8 = arith.constant 8 : index
    %c0_42 = arith.constant 0 : index
    %c0_43 = arith.constant 0 : index
    %47 = vector.load %arg3[%c8, %c0_42, %c0_43] : memref<9x8x4xf32, #tpu.memory_space<vmem>>, vector<1x8x4xf32>
    %48 = vector.shape_cast %47 : vector<1x8x4xf32> to vector<8x4xf32>
    %c0_44 = arith.constant 0 : index
    %c0_45 = arith.constant 0 : index
    %c34 = arith.constant 34 : index
    %49 = vector.load %arg2[%c0_44, %c0_45, %c34] : memref<1x4x272xf32, #tpu.memory_space<vmem>>, vector<1x4x224xf32>
    %50 = vector.shape_cast %49 : vector<1x4x224xf32> to vector<4x224xf32>
    %cst_46 = arith.constant dense<0.000000e+00> : vector<8x224xf32>
    %51 = tpu.matmul %48, %50, %cst_46 {dimension_numbers = #tpu.dot_dimension_numbers<[1], [0], [0], [1], [0, 0, 1, 1], [], []>} : vector<8x4xf32>, vector<4x224xf32>, vector<8x224xf32> -> vector<8x224xf32>
    %52 = arith.addf %46, %51 : vector<8x224xf32>
    %c0_47 = arith.constant 0 : index
    %c0_48 = arith.constant 0 : index
    %53 = vector.load %arg4[%c0_47, %c0_48] : memref<8x1xf32, #tpu.memory_space<vmem>>, vector<8x1xf32>
    %54 = vector.broadcast %53 : vector<8x1xf32> to vector<8x224xf32>
    %55 = arith.addf %52, %54 : vector<8x224xf32>
    %c0_49 = arith.constant 0 : index
    %c0_50 = arith.constant 0 : index
    %c0_51 = arith.constant 0 : index
    %56 = vector.load %arg5[%c0_49, %c0_50, %c0_51] : memref<1x8x224xf32, #tpu.memory_space<vmem>>, vector<1x8x224xf32>
    %57 = vector.shape_cast %56 : vector<1x8x224xf32> to vector<8x224xf32>
    %58 = vector.shape_cast %55 : vector<8x224xf32> to vector<1x8x224xf32>
    tpu.vector_store %arg5[%c0_49, %c0_50, %c0_51], %58 {strides = array<i32>} : memref<1x8x224xf32, #tpu.memory_space<vmem>>, vector<1x8x224xf32>,
    return
  }
  func.func @transform_0(%arg0: i32, %arg1: i32) -> (i32, i32, i32) {
    %c0_i32 = arith.constant 0 : i32
    %c0_i32_0 = arith.constant 0 : i32
    %c0_i32_1 = arith.constant 0 : i32
    return %arg0, %c0_i32, %c0_i32_0 : i32, i32, i32
  }
  func.func @transform_1(%arg0: i32, %arg1: i32) -> (i32, i32, i32) {
    %c0_i32 = arith.constant 0 : i32
    %c0_i32_0 = arith.constant 0 : i32
    %c0_i32_1 = arith.constant 0 : i32
    return %c0_i32, %arg1, %c0_i32_0 : i32, i32, i32
  }
  func.func @transform_2(%arg0: i32, %arg1: i32) -> (i32, i32) {
    %c0_i32 = arith.constant 0 : i32
    %c0_i32_0 = arith.constant 0 : i32
    return %arg1, %c0_i32 : i32, i32
  }
  func.func @transform_3(%arg0: i32, %arg1: i32) -> (i32, i32, i32) {
    %c0_i32 = arith.constant 0 : i32
    %c0_i32_0 = arith.constant 0 : i32
    return %arg0, %arg1, %c0_i32 : i32, i32, i32
  }
}

</mosaic_0001>

<bundles_post_ra>
// kernel: forward.1
= control target key start
LH: loop header
LB: loop body
LE: loop exit
PB: predicated region body
PF: predicated region fallthrough
CT: control target
= control target key end

     0   :  { %s1307_s12 = smov 0   ;;  %s1309_s13 = smov 0   ;;  %s1417_s0 = inlined_call_operand.vmem [shape: f32[2,4,272], index: 0, kind: input, shape index: {}]   ;;  %s1418_s1 = inlined_call_operand.vmem [shape: f32[9,8,4], index: 1, kind: input, shape index: {}]   ;;  %s1419_s2 = inlined_call_operand.vmem [shape: f32[8,1], index: 2, kind: input, shape index: {}]   ;;  %s1420_s3 = inlined_call_operand.vmem [shape: f32[2,8,224], index: 3, kind: output, shape index: {}]  }
   0x1   :  { %s1311_s14 = smov 0  }
   0x2 LB: > { %s25_s15 = sadd.s32 1, %s1271_s13  ;;  %p1174_p0 = scmp.ge.s32.totalorder %s1275_s14, 1  ;;  %s1275_s14 = sphi %s1311_s14, %s13_s14   ;;  %s1271_s13 = sphi %s1309_s13, %s1422_s13   ;;  %s1267_s12 = sphi %s1307_s12, %s1421_s12  }
   0x3   : > { %p27_p1 = scmp.ge.s32.totalorder %s25_s15, 2  ;;  %p169_p2 = scmp.lt.s32.totalorder %s1275_s14, 3 }
   0x5   : > { %s1424_s15 = smov (%p27_p1, %s25_s15), 0  ;;  %p170_p3 = pnand %p1174_p0, %p169_p2 }
   0x6   : > { %p205_p4 = scmp.lt.s32.totalorder (!%p170_p3), %s1267_s12, 1  ;;  %s1278_s20 = smov (!%p170_p3), 126  }
   0x7   : > { %173 = sbr.rel (%p170_p3) target bundleno = 367 (0x16f), region = 32  ;;  %s1279_s21 = smov (!%p170_p3), 127  }
   0x8   : > { %s1280_s24 = smov (!%p170_p3), 112   ;;  %s1281_s25 = smov (!%p170_p3), 111  }
   0x9   : > { %s1282_s26 = smov (!%p170_p3), 110   ;;  %s1283_s27 = smov (!%p170_p3), 96  }
   0xa   : > { %s1285_s28 = smov (!%p170_p3), 95   ;;  %s1286_s29 = smov (!%p170_p3), 94  }
   0xc   : > { %s1426_s12 = smov (!%p205_p4, %s1267_s12), 1  ;;  %v1277_v0 = vmov 0.0   ;;  %vm243_vm0 = vcmask 1043456   ;;  %v227_v3 = vld [vmem:[%s1418_s1] sm:$0xff]  ;;  %vm239_vm1 = vcmask 31744   ;;  %v1284_v5 = vmov 0  }
   0xd   : > { %390 = vmatprep.mubr.f32.mxu1 %v1277_v0  ;;  %312 = vmatprep.mubr.f32.mxu0 %v1277_v0  ;;  %s1216_s16 = smul.u32 12, %s1426_s12  ;;  %v1044_v7 = vld [vmem:[%s1419_s2] sm:$0xff]  ;;  %vm497_vm2 = vcmask 916480   ;;  %vm237_vm3 = vcmask 1039360   ;;  %vm406_vm4 = vcmask 1031168   ;;  %v1178_v14 = vld [vmem:[%s1418_s1 + $0x8] sm:$0xff] }
   0xe   : > { %1251 = vset.pattern.permute.xlu0 %v1284_v5  ;;  %vm588_vm5 = vcmask 908288   ;;  %v1189_v17 = vld [vmem:[%s1418_s1 + $0x18] sm:$0xff]  ;;  %v1185_v21 = vld [vmem:[%s1418_s1 + $0x10] sm:$0xff]  ;;  %vm679_vm6 = vcmask 900096   ;;  %v1193_v25 = vld [vmem:[%s1418_s1 + $0x20] sm:$0xff]  ;;  %vm770_vm7 = vcmask 785408  }
   0xf   : > { %s1333_s19 = scalar_lea.vmem %s1417_s0, %s1216_s16  ;;  %v1197_v26 = vld [vmem:[%s1418_s1 + $0x28] sm:$0xff]  ;;  %v1201_v30 = vld [vmem:[%s1418_s1 + $0x30] sm:$0xff]  ;;  %vm865_vm8 = vcmask 777216   ;;  %v1205_v37 = vld [vmem:[%s1418_s1 + $0x38] sm:$0xff]  ;;  %vm961_vm9 = vcmask 769024  }
  0x10   : > { %v399_v1 = vld [vmem:[%s1333_s19] sm:$0xff]  ;;  %v855_v4 = vld [vmem:[%s1333_s19 + $0x8] sm:$0xf] }
  0x11   : > { %402 = vrot.lane.b32.xlu1 %v399_v1, %s1278_s20  ;;  %v401_v2 = vcombine.high %v399_v1, %v399_v1  ;;  %233 = vrot.lane.b32.xlu0 %v399_v1, %s1279_s21  ;;  %v951_v6 = vld [vmem:[%s1333_s19 + $0x8] sm:$0xf]  ;;  %v1209_v43 = vld [vmem:[%s1418_s1 + $0x40] sm:$0xff] }
  0x13   : > { %1182 = vmatprep.subr.msk.mxu1 %vm243_vm0, %v401_v2 }
  0x14   : > { %1183 = vmatpush1.msk.msra.mxu1 %vm243_vm0, %v399_v1 }
  0x15   : > { %404 = vrot.lane.b32.xlu1 %v401_v2, %s1278_s20  ;;  %493 = vrot.lane.b32.xlu0 %v399_v1, %s1280_s24 }
  0x16   : > { %1184 = vmatmul.mubr.msk.f32.vlgmr.msra.gmra.mxu1 %vm239_vm1, %v227_v3 }
  0x17   : > { %570 = vmatprep.mubr.f32.mxu1 %v1277_v0 }
  0x19   : > { %495 = vrot.lane.b32.xlu1 %v401_v2, %s1280_s24  ;;  %235 = vrot.lane.b32.xlu0 %v401_v2, %s1279_s21 }
  0x1d   : > { %586 = vrot.lane.b32.xlu1 %v401_v2, %s1281_s25  ;;  %584 = vrot.lane.b32.xlu0 %v399_v1, %s1281_s25  ;;  %s1215_s25 = sshll.u32 %s1426_s12, 4 }
  0x21   : > { %677 = vrot.lane.b32.xlu1 %v401_v2, %s1282_s26  ;;  %675 = vrot.lane.b32.xlu0 %v399_v1, %s1282_s26 }
  0x25   : > { %768 = vrot.lane.b32.xlu1 %v401_v2, %s1283_s27  ;;  %766 = vrot.lane.b32.xlu0 %v399_v1, %s1283_s27 }
  0x29   : > { %863 = vrot.lane.b32.xlu1 %v855_v4, %s1285_s28  ;;  %861 = vrot.lane.b32.xlu0 %v401_v2, %s1285_s28 }
  0x2d   : > { %957 = vrot.lane.b32.xlu1 %v401_v2, %s1286_s29  ;;  %859 = vrot.lane.b32.xlu0 %v399_v1, %s1285_s28  ;;  %s226_s28 = scalar_lea.vmem %s1420_s3, %s1215_s25 }
  0x31   : > { %955 = vrot.lane.b32.xlu1 %v399_v1, %s1286_s29  ;;  %959 = vrot.lane.b32.xlu0 %v951_v6, %s1286_s29 }
  0x35   : > { %1047 = vperm.xlu0 %1251, %v1044_v7  }
  0x83   : > { %v403_v8 = vpop.permute.xlu1 %402  ;;  %v234_v9 = vpop.permute.xlu0 %233 }
  0x87   : > { %v405_v10 = vpop.permute.xlu1 %404  ;;  %v494_v11 = vpop.permute.xlu0 %493 }
  0x88   : > { %v407_v18 = vsel %vm406_vm4, %v403_v8, %v405_v10 }
  0x8b   : > { %v496_v12 = vpop.permute.xlu1 %495  ;;  %v236_v13 = vpop.permute.xlu0 %235 }
  0x8c   : > { %v498_v15 = vsel %vm497_vm2, %v494_v11, %v496_v12  ;;  %1179 = vmatprep.subr.msk.mxu0 %vm243_vm0, %v236_v13  ;;  %1190 = vmatprep.subr.msk.mxu1 %vm243_vm0, %v496_v12  ;;  %v238_v16 = vsel %vm237_vm3, %v234_v9, %v236_v13 }
  0x8d   : > { %1180 = vmatpush1.msk.msra.mxu0 %vm243_vm0, %v238_v16  ;;  %1191 = vmatpush1.msk.msra.mxu1 %vm243_vm0, %v498_v15 }
  0x8e   : > { %1181 = vmatmul.mubr.msk.f32.vlgmr.msra.gmra.mxu0 %vm239_vm1, %v1178_v14  ;;  %1186 = vmatprep.subr.msk.mxu0 %vm243_vm0, %v405_v10 }
  0x8f   : > { %v587_v19 = vpop.permute.xlu1 %586  ;;  %1187 = vmatpush1.msk.msra.mxu0 %vm243_vm0, %v407_v18  ;;  %v585_v20 = vpop.permute.xlu0 %584  ;;  %479 = vmatprep.mubr.f32.mxu0 %v1277_v0 }
  0x90   : > { %v589_v22 = vsel %vm588_vm5, %v585_v20, %v587_v19  ;;  %1194 = vmatprep.subr.msk.mxu0 %vm243_vm0, %v587_v19  ;;  %1192 = vmatmul.mubr.msk.f32.vlgmr.msra.gmra.mxu1 %vm239_vm1, %v1189_v17 }
  0x91   : > { %752 = vmatprep.mubr.f32.mxu1 %v1277_v0 }
  0x92   : > { %1188 = vmatmul.mubr.msk.f32.vlgmr.msra.gmra.mxu0 %vm239_vm1, %v1185_v21 }
  0x93   : > { %1195 = vmatpush1.msk.msra.mxu0 %vm243_vm0, %v589_v22  ;;  %v678_v23 = vpop.permute.xlu1 %677  ;;  %v676_v24 = vpop.permute.xlu0 %675  ;;  %661 = vmatprep.mubr.f32.mxu0 %v1277_v0 }
  0x94   : > { %v680_v27 = vsel %vm679_vm6, %v676_v24, %v678_v23  ;;  %1198 = vmatprep.subr.msk.mxu1 %vm243_vm0, %v678_v23 }
  0x95   : > { %1199 = vmatpush1.msk.msra.mxu1 %vm243_vm0, %v680_v27 }
  0x96   : > { %1196 = vmatmul.mubr.msk.f32.vlgmr.msra.gmra.mxu0 %vm239_vm1, %v1193_v25  ;;  %1200 = vmatmul.mubr.msk.f32.vlgmr.msra.gmra.mxu1 %vm239_vm1, %v1197_v26 }
  0x97   : > { %v769_v28 = vpop.permute.xlu1 %768  ;;  %v767_v29 = vpop.permute.xlu0 %766  ;;  %843 = vmatprep.mubr.f32.mxu0 %v1277_v0  ;;  %939 = vmatprep.mubr.f32.mxu1 %v1277_v0 }
  0x98   : > { %v771_v31 = vsel %vm770_vm7, %v767_v29, %v769_v28  ;;  %1202 = vmatprep.subr.msk.mxu0 %vm243_vm0, %v769_v28 }
  0x99   : > { %1203 = vmatpush1.msk.msra.mxu0 %vm243_vm0, %v771_v31 }
  0x9a   : > { %1204 = vmatmul.mubr.msk.f32.vlgmr.msra.gmra.mxu0 %vm239_vm1, %v1201_v30 }
  0x9b   : > { %v864_v32 = vpop.permute.xlu1 %863  ;;  %v862_v33 = vpop.permute.xlu0 %861  ;;  %1035 = vmatprep.mubr.f32.mxu0 %v1277_v0 }
  0x9c   : > { %v867_v34 = vsel %vm865_vm8, %v862_v33, %v864_v32 }
  0x9d   : > { %1206 = vmatprep.subr.msk.mxu1 %vm243_vm0, %v867_v34 }
  0x9f   : > { %v958_v35 = vpop.permute.xlu1 %957  ;;  %v860_v36 = vpop.permute.xlu0 %859 }
  0xa0   : > { %v866_v38 = vsel %vm865_vm8, %v860_v36, %v862_v33 }
  0xa1   : > { %1207 = vmatpush1.msk.msra.mxu1 %vm243_vm0, %v866_v38 }
  0xa2   : > { %1208 = vmatmul.mubr.msk.f32.vlgmr.msra.gmra.mxu1 %vm239_vm1, %v1205_v37 }
  0xa3   : > { %v956_v39 = vpop.permute.xlu1 %955  ;;  %v960_v40 = vpop.permute.xlu0 %959 }
  0xa4   : > { %v962_v41 = vsel %vm961_vm9, %v956_v39, %v958_v35  ;;  %v963_v42 = vsel %vm961_vm9, %v958_v35, %v960_v40 }
  0xa5   : > { %1210 = vmatprep.subr.msk.mxu0 %vm243_vm0, %v963_v42 }
  0xa6   : > { %1211 = vmatpush1.msk.msra.mxu0 %vm243_vm0, %v962_v41 }
  0xa7   : > { %1212 = vmatmul.mubr.msk.f32.vlgmr.msra.gmra.mxu0 %vm239_vm1, %v1209_v43 }
  0xb0   : > { %v1048_v10 = vpop.permute.xlu0 %1047 }
  0xd6   : > { %v392_v44 = vpop.f32.mrf.mxu1 }
  0xd8   : > { %v394_v45 = vpop.f32.mrf.mxu1 }
 0x14e   : > { %v314_v46 = vpop.f32.mrf.mxu0 }
 0x14f   : > { %v393_v47 = vadd.f32 %v392_v44, %v314_v46 }
 0x150   : > { %v316_v48 = vpop.f32.mrf.mxu0  ;;  %v572_v50 = vpop.f32.mrf.mxu1 }
 0x151   : > { %v395_v49 = vadd.f32 %v394_v45, %v316_v48 }
 0x152   : > { %v481_v51 = vpop.f32.mrf.mxu0  ;;  %v574_v55 = vpop.f32.mrf.mxu1 }
 0x153   : > { %v486_v52 = vadd.f32 %v481_v51, %v393_v47 }
 0x154   : > { %v483_v53 = vpop.f32.mrf.mxu0 }
 0x155   : > { %v487_v54 = vadd.f32 %v483_v53, %v395_v49  ;;  %v577_v56 = vadd.f32 %v572_v50, %v486_v52 }
 0x156   : > { %v663_v57 = vpop.f32.mrf.mxu0  ;;  %v754_v60 = vpop.f32.mrf.mxu1 }
 0x157   : > { %v578_v58 = vadd.f32 %v574_v55, %v487_v54  ;;  %v668_v61 = vadd.f32 %v663_v57, %v577_v56 }
 0x158   : > { %v665_v59 = vpop.f32.mrf.mxu0  ;;  %v756_v63 = vpop.f32.mrf.mxu1 }
 0x159   : > { %v669_v62 = vadd.f32 %v665_v59, %v578_v58  ;;  %v759_v1 = vadd.f32 %v754_v60, %v668_v61 }
 0x15a   : > { %v845_v0 = vpop.f32.mrf.mxu0 }
 0x15b   : > { %v760_v2 = vadd.f32 %v756_v63, %v669_v62  ;;  %v850_v4 = vadd.f32 %v845_v0, %v759_v1 }
 0x15c   : > { %v847_v3 = vpop.f32.mrf.mxu0 }
 0x15d   : > { %v851_v6 = vadd.f32 %v847_v3, %v760_v2 }
 0x162   : > { %v941_v5 = vpop.f32.mrf.mxu1 }
 0x163   : > { %v946_v8 = vadd.f32 %v941_v5, %v850_v4 }
 0x164   : > { %v943_v7 = vpop.f32.mrf.mxu1 }
 0x165   : > { %v947_v11 = vadd.f32 %v943_v7, %v851_v6 }
 0x167   : > { %v1037_v9 = vpop.f32.mrf.mxu0 }
 0x168   : > { %v1042_v12 = vadd.f32 %v1037_v9, %v946_v8 }
 0x169   : > { %v1039_v13 = vpop.f32.mrf.mxu0 }
 0x16a   : > { %v1043_v14 = vadd.f32 %v1039_v13, %v947_v11  ;;  %v1050_v15 = vadd.f32 %v1048_v10, %v1042_v12 }
 0x16c   : > { %v1051_v16 = vadd.f32 %v1048_v10, %v1043_v14  ;;  %1052 = vst [vmem:[%s226_s28] sm:$0xff] %v1050_v15 }
 0x16e   : > { %1053 = vst.msk [vmem:[%s226_s28 + $0x8] sm:$0xff] %vm770_vm7, %v1051_v16 }
 0x16f PF: > { %s13_s14 = sadd.s32 1, %s1275_s14   ;;  %s1421_s12 = smov %s1271_s13 }
 0x170   : > { %p10_p5 = scmp.ge.s32.totalorder %s13_s14, 4   ;;  %s1422_s13 = smov %s1424_s15 }
 0x172   :  { %12 = sbr.rel (!%p10_p5) target bundleno = 2 (0x2), region = 76 }

</bundles_post_ra>
